<compile_context>
chip_gen: v6e
topology: v6e:2x2x1
jax: 0.10.0
libtpu: 0.0.40
codegen_flags: <defaults>
</compile_context>

<pallas_src>
import functools

import jax
import jax.numpy as jnp
from jax import lax
from jax.experimental import pallas as pl
from jax.experimental.pallas import tpu as pltpu

LN_EPS = 1e-5
NEG_INF = -1e9


def _ln(x, w, b):
    """fp32 LayerNorm over the last dim. x: [M, D]; w, b broadcastable [1, D]."""
    x = x.astype(jnp.float32)
    mu = jnp.mean(x, axis=-1, keepdims=True)
    var = jnp.mean((x - mu) ** 2, axis=-1, keepdims=True)
    return (x - mu) * lax.rsqrt(var + LN_EPS) * w + b


# ------------------------------- kernels --------------------------------

def patch_embed_kernel(p_ref, w_ref, o_ref):
    # conv1(stride == kernel, bias=False) as a patch matmul. bf16 in, fp32 out.
    o_ref[...] = jnp.dot(p_ref[...], w_ref[...],
                         preferred_element_type=jnp.float32)


def transformer_kernel(x_ref, lnpre_w, lnpre_b,
                       ln1w, ln1b, wqkv, bqkv, wo, bo,
                       ln2w, ln2b, wfc, bfc, wpr, bpr,
                       lnpost_w, lnpost_b, proj,
                       out_ref, tok, attn_scr, *, n_head, n_real):
    """One grid step == one ResidualAttentionBlock (grid axis 0 = layer index).

    The fp32 residual stream persists in the `tok` VMEM scratch across the
    layer grid; layer 0 applies ln_pre, the last layer applies ln_post + proj
    on the CLS tokens and writes the only HBM output.
    """
    B, Npad, D = x_ref.shape
    M = B * Npad
    dh = D // n_head
    scale = dh ** -0.5
    bf16 = jnp.bfloat16

    layer = pl.program_id(0)
    n_layers = pl.num_programs(0)

    # ---- layer 0: ln_pre on the (padded) token sequence --------------------
    @pl.when(layer == 0)
    def _():
        tok[...] = _ln(x_ref[...].reshape(M, D), lnpre_w[...], lnpre_b[...])

    x = tok[...]                                                    # [M, D] fp32

    # ---- attention: ln_1 -> qkv (batch folded into M) -> per-head einsum ---
    h = _ln(x, ln1w[...], ln1b[...]).astype(bf16)
    qkv = jnp.dot(h, wqkv[...], preferred_element_type=jnp.float32) + bqkv[...]
    q = (qkv[:, :D] * scale).astype(bf16)
    k = qkv[:, D:2 * D].astype(bf16)
    v = qkv[:, 2 * D:].astype(bf16)

    key_bias = None
    if n_real < Npad:                       # static: mask the padded keys
        kidx = lax.broadcasted_iota(jnp.int32, (1, Npad), 1)
        key_bias = jnp.where(kidx < n_real, 0.0, NEG_INF).astype(jnp.float32)

    for hh in range(n_head):                # static & small; batched over B
        sl = slice(hh * dh, (hh + 1) * dh)
        qh = q[:, sl].reshape(B, Npad, dh)
        kh = k[:, sl].reshape(B, Npad, dh)
        vh = v[:, sl].reshape(B, Npad, dh)
        s = jnp.einsum('bqd,bkd->bqk', qh, kh,
                       preferred_element_type=jnp.float32)          # [B,Npad,Npad]
        if key_bias is not None:
            s = s + key_bias
        s = s - jnp.max(s, axis=-1, keepdims=True)
        p = jnp.exp(s)
        p = p * pl.reciprocal(jnp.sum(p, axis=-1, keepdims=True), approx=True)
        oh = jnp.einsum('bqk,bkd->bqd', p.astype(bf16), vh,
                        preferred_element_type=jnp.float32)          # [B,Npad,dh]
        attn_scr[:, sl] = oh.reshape(M, dh)   # write head slice, no concatenate

    attn = jnp.dot(attn_scr[...].astype(bf16), wo[...],
                   preferred_element_type=jnp.float32) + bo[...]
    x1 = x + attn                                                   # residual 1

    # ---- MLP: ln_2 -> c_fc -> QuickGELU -> c_proj --------------------------
    h2 = _ln(x1, ln2w[...], ln2b[...]).astype(bf16)
    ff = jnp.dot(h2, wfc[...], preferred_element_type=jnp.float32) + bfc[...]
    ff = (ff * jax.nn.sigmoid(1.702 * ff)).astype(bf16)             # QuickGELU
    mo = jnp.dot(ff, wpr[...], preferred_element_type=jnp.float32) + bpr[...]
    tok[...] = x1 + mo                                              # residual 2

    # ---- last layer: ln_post on CLS token + output projection --------------
    @pl.when(layer == n_layers - 1)
    def _():
        cls = tok[...].reshape(B, Npad, D)[:, 0, :]                 # [B, D]
        cn = _ln(cls, lnpost_w[...], lnpost_b[...]).astype(bf16)
        out_ref[...] = jnp.dot(cn, proj[...],
                               preferred_element_type=jnp.float32)


# -------------------------------- wrapper --------------------------------

def vit_csprompt_forward(x_img, params, n_head):
    f32, bf16 = jnp.float32, jnp.bfloat16
    B, C, H, W = x_img.shape
    conv_w = params['conv1_w']
    D = conv_w.shape[0]
    ps = conv_w.shape[2]
    Hp, Wp = H // ps, W // ps
    Np = Hp * Wp
    N = Np + 1                             # + class token
    Npad = ((N + 7) // 8) * 8              # sublane-aligned sequence length
    out_dim = params['proj'].shape[1]
    blocks = params['blocks']
    L = len(blocks)

    # --- forward_init_token: conv1 (stride == kernel, no bias) as patch matmul
    patches = x_img.reshape(B, C, Hp, ps, Wp, ps).transpose(0, 2, 4, 1, 3, 5)
    patches = patches.reshape(B * Np, C * ps * ps).astype(bf16)
    w_patch = conv_w.reshape(D, C * ps * ps).T.astype(bf16)          # [K, D]
    emb = pl.pallas_call(
        patch_embed_kernel,
        out_shape=jax.ShapeDtypeStruct((B * Np, D), f32),
        in_specs=[pl.BlockSpec(memory_space=pltpu.MemorySpace.VMEM)] * 2,
        out_specs=pl.BlockSpec(memory_space=pltpu.MemorySpace.VMEM),
    )(patches, w_patch).reshape(B, Np, D)

    cls = jnp.broadcast_to(params['class_embedding'].reshape(1, 1, D), (B, 1, D))
    tokens = jnp.concatenate([cls, emb], axis=1) + params['positional_embedding'][None]
    tokens = jnp.pad(tokens, ((0, 0), (0, Npad - N), (0, 0))).astype(f32)

    # --- stack per-layer weights along a leading layer axis (grid axis 0) ----
    def stk(name, transpose=False, dtype=f32, row=False):
        ws = []
        for b in blocks:
            w = b[name]
            if transpose:
                w = w.T
            if row:
                w = w.reshape(1, -1)
            ws.append(w)
        return jnp.stack(ws).astype(dtype)

    ln1w = stk('ln1_w', row=True)
    ln1b = stk('ln1_b', row=True)
    wqkv = stk('w_in', transpose=True, dtype=bf16)     # [L, D, 3D]
    bqkv = stk('b_in', row=True)
    wo = stk('w_out', transpose=True, dtype=bf16)      # [L, D, D]
    bo = stk('b_out', row=True)
    ln2w = stk('ln2_w', row=True)
    ln2b = stk('ln2_b', row=True)
    wfc = stk('w_fc', transpose=True, dtype=bf16)      # [L, D, 4D]
    bfc = stk('b_fc', row=True)
    wpr = stk('w_pr', transpose=True, dtype=bf16)      # [L, 4D, D]
    bpr = stk('b_pr', row=True)

    c2 = lambda l: (0, 0)
    c3 = lambda l: (0, 0, 0)
    lm = lambda l: (l, 0, 0)

    in_specs = [
        pl.BlockSpec((B, Npad, D), c3),            # tokens (resident across layers)
        pl.BlockSpec((1, D), c2),                  # ln_pre w
        pl.BlockSpec((1, D), c2),                  # ln_pre b
        pl.BlockSpec((None, 1, D), lm),            # ln1 w
        pl.BlockSpec((None, 1, D), lm),            # ln1 b
        pl.BlockSpec((None, D, 3 * D), lm),        # qkv weight (bf16, streamed)
        pl.BlockSpec((None, 1, 3 * D), lm),        # qkv bias
        pl.BlockSpec((None, D, D), lm),            # attn out-proj weight (bf16)
        pl.BlockSpec((None, 1, D), lm),            # attn out-proj bias
        pl.BlockSpec((None, 1, D), lm),            # ln2 w
        pl.BlockSpec((None, 1, D), lm),            # ln2 b
        pl.BlockSpec((None, D, 4 * D), lm),        # c_fc weight (bf16)
        pl.BlockSpec((None, 1, 4 * D), lm),        # c_fc bias
        pl.BlockSpec((None, 4 * D, D), lm),        # c_proj weight (bf16)
        pl.BlockSpec((None, 1, D), lm),            # c_proj bias
        pl.BlockSpec((1, D), c2),                  # ln_post w
        pl.BlockSpec((1, D), c2),                  # ln_post b
        pl.BlockSpec((D, out_dim), c2),            # proj (bf16)
    ]

    kern = functools.partial(transformer_kernel, n_head=n_head, n_real=N)
    out = pl.pallas_call(
        kern,
        out_shape=jax.ShapeDtypeStruct((B, out_dim), f32),
        grid_spec=pltpu.PrefetchScalarGridSpec(
            num_scalar_prefetch=0,
            grid=(L,),
            in_specs=in_specs,
            out_specs=pl.BlockSpec((B, out_dim), c2),
            scratch_shapes=[pltpu.VMEM((B * Npad, D), f32),     # residual stream
                            pltpu.VMEM((B * Npad, D), f32)]),   # attn head outputs
        compiler_params=pltpu.CompilerParams(
            dimension_semantics=("arbitrary",),     # layer axis carries state
            vmem_limit_bytes=48 * 1024 * 1024),
    )(tokens,
      params['ln_pre_w'].reshape(1, D).astype(f32),
      params['ln_pre_b'].reshape(1, D).astype(f32),
      ln1w, ln1b, wqkv, bqkv, wo, bo,
      ln2w, ln2b, wfc, bfc, wpr, bpr,
      params['ln_post_w'].reshape(1, D).astype(f32),
      params['ln_post_b'].reshape(1, D).astype(f32),
      params['proj'].astype(bf16))
    return out


# ---------------------------- pure-JAX reference ----------------------------

def _ref_ln(x, w, b):
    mu = jnp.mean(x, -1, keepdims=True)
    var = jnp.mean((x - mu) ** 2, -1, keepdims=True)
    return (x - mu) / jnp.sqrt(var + LN_EPS) * w + b


def reference_forward(x_img, params, n_head):
    B, C, H, W = x_img.shape
    conv_w = params['conv1_w']
    D = conv_w.shape[0]
    ps = conv_w.shape[2]
    Hp, Wp = H // ps, W // ps
    patches = x_img.reshape(B, C, Hp, ps, Wp, ps).transpose(0, 2, 4, 1, 3, 5)
    patches = patches.reshape(B, Hp * Wp, C * ps * ps)
    emb = patches @ conv_w.reshape(D, -1).T
    cls = jnp.broadcast_to(params['class_embedding'].reshape(1, 1, D), (B, 1, D))
    x = jnp.concatenate([cls, emb], axis=1) + params['positional_embedding'][None]
    x = _ref_ln(x, params['ln_pre_w'], params['ln_pre_b'])
    for blk in params['blocks']:
        Bx, N, _ = x.shape
        dh = D // n_head
        h = _ref_ln(x, blk['ln1_w'], blk['ln1_b'])
        qkv = h @ blk['w_in'].T + blk['b_in']
        q, k, v = jnp.split(qkv, 3, axis=-1)
        q = q.reshape(Bx, N, n_head, dh).transpose(0, 2, 1, 3) * dh ** -0.5
        k = k.reshape(Bx, N, n_head, dh).transpose(0, 2, 1, 3)
        v = v.reshape(Bx, N, n_head, dh).transpose(0, 2, 1, 3)
        a = jax.nn.softmax(q @ k.transpose(0, 1, 3, 2), axis=-1)
        o = (a @ v).transpose(0, 2, 1, 3).reshape(Bx, N, D)
        x = x + o @ blk['w_out'].T + blk['b_out']
        h = _ref_ln(x, blk['ln2_w'], blk['ln2_b'])
        ff = h @ blk['w_fc'].T + blk['b_fc']
        ff = ff * jax.nn.sigmoid(1.702 * ff)
        x = x + ff @ blk['w_pr'].T + blk['b_pr']
    cls_tok = _ref_ln(x[:, 0, :], params['ln_post_w'], params['ln_post_b'])
    return cls_tok @ params['proj']


# ---------------------------- deterministic params ----------------------------

def init_params(key, D, layers, ps, n_tokens, out_dim):
    scale = D ** -0.5
    keys = iter(jax.random.split(key, 8 + layers * 12))

    def nrm(shape, s):
        return (s * jax.random.normal(next(keys), shape)).astype(jnp.float32)

    params = {
        'conv1_w': nrm((D, 3, ps, ps), 0.05),
        'class_embedding': nrm((D,), scale),
        'positional_embedding': nrm((n_tokens, D), scale),
        'ln_pre_w': 1.0 + nrm((D,), 0.01), 'ln_pre_b': nrm((D,), 0.01),
        'ln_post_w': 1.0 + nrm((D,), 0.01), 'ln_post_b': nrm((D,), 0.01),
        'proj': nrm((D, out_dim), scale),
        'blocks': [],
    }
    for _ in range(layers):
        params['blocks'].append({
            'ln1_w': 1.0 + nrm((D,), 0.01), 'ln1_b': nrm((D,), 0.01),
            'w_in': nrm((3 * D, D), 0.05), 'b_in': nrm((3 * D,), 0.01),
            'w_out': nrm((D, D), 0.05), 'b_out': nrm((D,), 0.01),
            'ln2_w': 1.0 + nrm((D,), 0.01), 'ln2_b': nrm((D,), 0.01),
            'w_fc': nrm((4 * D, D), 0.05), 'b_fc': nrm((4 * D,), 0.01),
            'w_pr': nrm((D, 4 * D), 0.05), 'b_pr': nrm((D,), 0.01),
        })
    return params


if __name__ == "__main__":
    B, C = 2, 3
    input_resolution, patch_size = 16, 4
    width, layers, heads, output_dim = 32, 2, 4, 16
    n_tokens = (input_resolution // patch_size) ** 2 + 1   # 17

    key = jax.random.PRNGKey(0)
    k_img, k_par = jax.random.split(key)
    x_img = jax.random.normal(k_img, (B, C, input_resolution, input_resolution),
                              dtype=jnp.float32)
    params = init_params(k_par, width, layers, patch_size, n_tokens, output_dim)

    out = jax.block_until_ready(vit_csprompt_forward(x_img, params, heads))
    ref = reference_forward(x_img, params, heads)
    assert out.shape == (B, output_dim)
    max_err = float(jnp.max(jnp.abs(out - ref)))
    assert jnp.allclose(out, ref, atol=3e-2, rtol=3e-2), max_err
    print("KERNEL_OK")
</pallas_src>

<mosaic_0001>
module attributes {stable_mosaic.version = 11 : i64} {
  func.func @patch_embed_kernel(%arg0: memref<32x48xbf16, #tpu.memory_space<vmem>>, %arg1: memref<48x32xbf16, #tpu.memory_space<vmem>>, %arg2: memref<32x32xf32, #tpu.memory_space<vmem>>) attributes {dimension_semantics = [], scalar_prefetch = 0 : i64, scratch_operands = 0 : i64, tpu.core_type = #tpu.core_type<tc>} {
    %c0 = arith.constant 0 : index
    %c0_0 = arith.constant 0 : index
    %0 = vector.load %arg0[%c0, %c0_0] : memref<32x48xbf16, #tpu.memory_space<vmem>>, vector<32x48xbf16>
    %c0_1 = arith.constant 0 : index
    %c0_2 = arith.constant 0 : index
    %1 = vector.load %arg1[%c0_1, %c0_2] : memref<48x32xbf16, #tpu.memory_space<vmem>>, vector<48x32xbf16>
    %cst = arith.constant dense<0.000000e+00> : vector<32x32xf32>
    %2 = tpu.matmul %0, %1, %cst {dimension_numbers = #tpu.dot_dimension_numbers<[1], [0], [0], [1], [0, 0, 1, 1], [], []>} : vector<32x48xbf16>, vector<48x32xbf16>, vector<32x32xf32> -> vector<32x32xf32>
    %c0_3 = arith.constant 0 : index
    %c0_4 = arith.constant 0 : index
    %3 = vector.load %arg2[%c0_3, %c0_4] : memref<32x32xf32, #tpu.memory_space<vmem>>, vector<32x32xf32>
    tpu.vector_store %arg2[%c0_3, %c0_4], %2 {strides = array<i32>} : memref<32x32xf32, #tpu.memory_space<vmem>>, vector<32x32xf32>,
    return
  }
}

</mosaic_0001>

<bundles_post_ra>
// kernel: tpu_custom_call.1
= control target key start
LH: loop header
LB: loop body
LE: loop exit
PB: predicated region body
PF: predicated region fallthrough
CT: control target
= control target key end

     0   :  { %vm51_vm0 = vcmask 392192   ;;  %s216_s0 = inlined_call_operand.vmem [shape: bf16[32,48], index: 0, kind: input, shape index: {}]   ;;  %s217_s1 = inlined_call_operand.vmem [shape: bf16[48,32], index: 1, kind: input, shape index: {}]   ;;  %s218_s2 = inlined_call_operand.hbm [shape: f32[32,32], index: 2, kind: output, shape index: {}]  }
   0x1   :  { %v153_v0 = vld [vmem:[%s217_s1 + $0x10] sm:$0xff]   ;;  %v154_v1 = vld [vmem:[%s217_s1 + $0x8] sm:$0xff]   ;;  %v156_v2 = vld [vmem:[%s216_s0] sm:$0xff]  }
   0x2   :  { %140 = vmatprep.subr.bf16.mxu0 %v153_v0  ;;  %v155_v3 = vld [vmem:[%s217_s1] sm:$0xff]   ;;  %146 = vmatprep.mubr.msk.bf16.mxu0 %vm51_vm0, %v156_v2 }
   0x3   :  { %141 = vmatpush3.bf16.msra.mxu0 %v153_v0 }
   0x4   :  { %142 = vmatprep.subr.bf16.mxu0 %v154_v1 }
   0x5   :  { %7 = vsyncpa [#allocation3], 0  ;;  %v157_v4 = vld [vmem:[%s216_s0 + $0x8] sm:$0xff]   ;;  %vm107_vm1 = vcmask 261120   ;;  %s180_s19 = smov [#allocation2]  }
   0x6   :  { %s117_s20 = sshll.u32 %s180_s19, 4  ;;  %s118_s20 = int_to_ptr.vmem [resolvable:$true] %s117_s20 }
   0x7   :  { %143 = vmatpush3.bf16.msra.mxu0 %v154_v1  ;;  %s158_s1 = scalar_lea.vmem %s118_s20, 512  ;;  %p163_p1 = scmp.lt.s32.totalorder %s118_s20, %s118_s20 }
   0x8   :  { %144 = vmatprep.subr.bf16.mxu0 %v155_v3  ;;  %p159_p0 = scmp.ne.s32.totalorder %s118_s20, %s158_s1  ;;  %p164_p2 = scmp.lt.s32.totalorder %s158_s1, %s158_s1 }
   0xa   :  { %p165_p3 = por %p164_p2, %p163_p1 }
   0xb   :  { %145 = vmatpush3.bf16.msra.mxu0 %v155_v3 }
   0xc   :  { %p166_p4 = pnand %p165_p3, %p159_p0 }
   0xe   :  { %147 = vmatmul.mubr.msk.bf16.vlgmr.msra.gmra.mxu0 %vm51_vm0, %v157_v4 }
  0xce   :  { %v148_v5 = vpop.f32.mrf.mxu0 }
  0xcf   :  { %110 = vst.msk [vmem:[#allocation2 + $0x10] sm:$0xff] %vm107_vm1, %v148_v5 }
  0xd0   :  { %v92_v6 = vpop.f32.mrf.mxu0 }
  0xd1   :  { %108 = vst.msk [vmem:[#allocation2] sm:$0xff] %vm107_vm1, %v92_v6 }
  0xd2   :  { %v149_v7 = vpop.f32.mrf.mxu0 }
  0xd3   :  { %111 = vst.msk [vmem:[#allocation2 + $0x18] sm:$0xff] %vm107_vm1, %v149_v7 }
  0xd4   :  { %v95_v8 = vpop.f32.mrf.mxu0 }
  0xd5   :  { %109 = vst.msk [vmem:[#allocation2 + $0x8] sm:$0xff] %vm107_vm1, %v95_v8 }
  0xd6   :  { %169 = shalt.err (!%p166_p4)
}
  0xd7   :  { %s181_s0 = smov 128   ;;  %s182_s21 = smov 8  }
  0xd8   :  { %123 = dma.vmem_to_hbm [thread:$0]  %s118_s20, 512, %s218_s2, [#allocation3], %s181_s0, %s181_s0, %s182_s21  }
  0xd9   :  { %178 = dma.done.wait [#allocation3], 512  }
  0xda   :  { %179 = vsyncadd [#allocation3], 4294966784 }
  0xdb   :  { %127 = vsyncpa [#allocation3], 1 }

</bundles_post_ra>
